<compile_context>
chip_gen: v5e
topology: v5e:2x2
jax: 0.10.0
libtpu: 0.0.40
codegen_flags: <defaults>
</compile_context>

<pallas_src>
import functools

import jax
import jax.numpy as jnp
import numpy as np
from jax.experimental import pallas as pl
from jax.experimental.pallas import tpu as pltpu


def _round_up(x, m):
    return (x + m - 1) // m * m


# ----------------------------------------------------------------------------
# Kernel: rows of points -> sigmoid(w3 @ relu(w2' @ relu(w1' @ x + b1) + b2))
# where w1'/w2' have the BN scales pre-folded.  Each grid step processes one
# (tm, C) slab of points; weights/biases are constant blocks (VMEM-resident).
# ----------------------------------------------------------------------------
def classify_kernel(x_ref, w1_ref, b1_ref, w2_ref, b2_ref, w3_ref, o_ref):
    # x_ref is already bf16; MXU matmuls in bf16 with f32 accumulation.
    h = jnp.dot(x_ref[...], w1_ref[...],
                preferred_element_type=jnp.float32)                   # (tm, 256)
    h = jnp.maximum(h + b1_ref[...], 0.0)
    h = jnp.dot(h.astype(jnp.bfloat16), w2_ref[...],
                preferred_element_type=jnp.float32)                   # (tm, 128)
    h = jnp.maximum(h + b2_ref[...], 0.0)
    z = jnp.dot(h.astype(jnp.bfloat16), w3_ref[...],
                preferred_element_type=jnp.float32)                   # (tm, 1)
    o_ref[...] = 1.0 / (1.0 + jnp.exp(-z))                            # sigmoid


@functools.partial(jax.jit, static_argnames=("tile_m",))
def classify_forward(x, p, tile_m=4096):
    """x: (B, N, emb_dims) channel-last (same layout as the module's forward
    input).  Returns (B, N, 1) sigmoid inlier scores, like the PyTorch module."""
    B, N, C = x.shape
    M = B * N
    # bf16 activations: halves the HBM input stream (the kernel computes in
    # bf16 anyway).  Single fused cast+reshape; no padding pass.
    xf = x.reshape(M, C).astype(jnp.bfloat16)

    # Row tile: multiple of 16 (bf16 sublane packing).  Keep >= 2 grid steps
    # when there is enough work so both v7x TensorCores get row tiles and the
    # x stream stays double-buffered.
    tm = min(tile_m, _round_up(M, 16))
    if M >= 2048 and pl.cdiv(M, tm) < 2:
        tm = _round_up(pl.cdiv(M, 2), 16)
    grid = pl.cdiv(M, tm)

    # Fold eval-mode BN scale into the conv weights in f32, then cast to bf16;
    # only the bias adds remain in the kernel.
    w1 = (p['w1'] * p['s1']).astype(jnp.bfloat16)
    w2 = (p['w2'] * p['s2']).astype(jnp.bfloat16)
    w3 = p['w3'].astype(jnp.bfloat16)
    b1 = p['b1'].astype(jnp.float32)
    b2 = p['b2'].astype(jnp.float32)

    flops = 2 * M * (C * 256 + 256 * 128 + 128 * 1)
    bytes_accessed = (M * C * 2                                  # bf16 x
                      + M * 4                                    # f32 output
                      + (C * 256 + 256 * 128 + 128) * 2          # bf16 weights
                      + (256 + 128) * 4)                         # f32 biases

    const = lambda shape: pl.BlockSpec(shape, lambda i: (0,) * len(shape))
    out = pl.pallas_call(
        classify_kernel,
        out_shape=jax.ShapeDtypeStruct((M, 1), jnp.float32),
        grid=(grid,),
        in_specs=[
            pl.BlockSpec((tm, C), lambda i: (i, 0)),
            const((C, 256)), const((1, 256)),
            const((256, 128)), const((1, 128)),
            const((128, 1)),
        ],
        out_specs=pl.BlockSpec((tm, 1), lambda i: (i, 0)),
        compiler_params=pltpu.CompilerParams(
            dimension_semantics=("parallel",),
            vmem_limit_bytes=48 * 1024 * 1024),
        cost_estimate=pl.CostEstimate(
            flops=flops, transcendentals=M, bytes_accessed=bytes_accessed),
    )(xf, w1, b1, w2, b2, w3)
    return out.reshape(B, N, 1)


# ----------------------------------------------------------------------------
# Parameter setup / reference
# ----------------------------------------------------------------------------
def fold_bn(gamma, beta, mean, var, eps=1e-5):
    scale = gamma / jnp.sqrt(var + eps)
    bias = beta - mean * scale
    return scale[None, :], bias[None, :]


def make_params(key, emb_dims=512):
    ks = jax.random.split(key, 8)

    def w(k, shape, fan_in):
        return jax.random.normal(k, shape, jnp.float32) / np.sqrt(fan_in)

    def bn(k, c):
        k1, k2, k3, k4 = jax.random.split(k, 4)
        gamma = 1.0 + 0.1 * jax.random.normal(k1, (c,), jnp.float32)
        beta = 0.1 * jax.random.normal(k2, (c,), jnp.float32)
        mean = 0.1 * jax.random.normal(k3, (c,), jnp.float32)
        var = 1.0 + 0.1 * jax.random.uniform(k4, (c,), jnp.float32)
        return gamma, beta, mean, var

    p = {}
    # 1x1 conv weights stored as (C_in, C_out); convs are bias-free.
    p['w1'] = w(ks[0], (emb_dims, 256), emb_dims)
    p['w2'] = w(ks[1], (256, 128), 256)
    p['w3'] = w(ks[2], (128, 1), 128)
    p['s1'], p['b1'] = fold_bn(*bn(ks[3], 256))
    p['s2'], p['b2'] = fold_bn(*bn(ks[4], 128))
    return p


def reference_forward(x, p):
    """Pure-JAX f32 reference matching the PyTorch module semantics."""
    xf = x.astype(jnp.float32)
    h = jnp.maximum(xf @ p['w1'] * p['s1'] + p['b1'], 0.0)
    h = jnp.maximum(h @ p['w2'] * p['s2'] + p['b2'], 0.0)
    z = h @ p['w3']
    return jax.nn.sigmoid(z)                                           # (B, N, 1)


if __name__ == "__main__":
    key = jax.random.PRNGKey(0)
    k_param, k_x = jax.random.split(key)
    params = make_params(k_param)

    B, N, C = 2, 16, 512   # small batch / few points; emb_dims fixed by module
    x = jax.random.normal(k_x, (B, N, C), jnp.float32)

    out = jax.block_until_ready(classify_forward(x, params))
    ref = jax.block_until_ready(reference_forward(x, params))

    # bf16 activations/weights with f32 accumulation vs. pure-f32 reference.
    np.testing.assert_allclose(np.asarray(out), np.asarray(ref),
                               rtol=2e-2, atol=2e-2)
    assert out.shape == (B, N, 1)
    assert not np.any(np.isnan(np.asarray(out)))
    print("KERNEL_OK")
</pallas_src>

<mosaic_0001>
module attributes {stable_mosaic.version = 11 : i64} {
  func.func @classify_kernel(%arg0: i32, %arg1: memref<32x512xbf16, #tpu.memory_space<vmem>>, %arg2: memref<512x256xbf16, #tpu.memory_space<vmem>>, %arg3: memref<1x256xf32, #tpu.memory_space<vmem>>, %arg4: memref<256x128xbf16, #tpu.memory_space<vmem>>, %arg5: memref<1x128xf32, #tpu.memory_space<vmem>>, %arg6: memref<128x1xbf16, #tpu.memory_space<vmem>>, %arg7: memref<32x1xf32, #tpu.memory_space<vmem>>) attributes {dimension_semantics = [#tpu.dimension_semantics<parallel>], iteration_bounds = array<i64: 1>, scalar_prefetch = 0 : i64, scratch_operands = 0 : i64, tpu.core_type = #tpu.core_type<tc>, window_params = [{transform_indices = @transform_0, window_bounds = array<i64: 32, 512>}, {pipeline_mode = #tpu.pipeline_mode<synchronous>, transform_indices = @transform_1, window_bounds = array<i64: 512, 256>}, {pipeline_mode = #tpu.pipeline_mode<synchronous>, transform_indices = @transform_2, window_bounds = array<i64: 1, 256>}, {pipeline_mode = #tpu.pipeline_mode<synchronous>, transform_indices = @transform_3, window_bounds = array<i64: 256, 128>}, {pipeline_mode = #tpu.pipeline_mode<synchronous>, transform_indices = @transform_4, window_bounds = array<i64: 1, 128>}, {pipeline_mode = #tpu.pipeline_mode<synchronous>, transform_indices = @transform_5, window_bounds = array<i64: 128, 1>}, {transform_indices = @transform_6, window_bounds = array<i64: 32, 1>}]} {
    %c0 = arith.constant 0 : index
    %c0_0 = arith.constant 0 : index
    %0 = vector.load %arg1[%c0, %c0_0] : memref<32x512xbf16, #tpu.memory_space<vmem>>, vector<32x512xbf16>
    %c0_1 = arith.constant 0 : index
    %c0_2 = arith.constant 0 : index
    %1 = vector.load %arg2[%c0_1, %c0_2] : memref<512x256xbf16, #tpu.memory_space<vmem>>, vector<512x256xbf16>
    %cst = arith.constant dense<0.000000e+00> : vector<32x256xf32>
    %2 = tpu.matmul %0, %1, %cst {dimension_numbers = #tpu.dot_dimension_numbers<[1], [0], [0], [1], [0, 0, 1, 1], [], []>} : vector<32x512xbf16>, vector<512x256xbf16>, vector<32x256xf32> -> vector<32x256xf32>
    %c0_3 = arith.constant 0 : index
    %c0_4 = arith.constant 0 : index
    %3 = vector.load %arg3[%c0_3, %c0_4] : memref<1x256xf32, #tpu.memory_space<vmem>>, vector<1x256xf32>
    %4 = vector.broadcast %3 : vector<1x256xf32> to vector<32x256xf32>
    %5 = arith.addf %2, %4 : vector<32x256xf32>
    %cst_5 = arith.constant 0.000000e+00 : f32
    %6 = vector.broadcast %cst_5 : f32 to vector<32x256xf32>
    %7 = arith.maximumf %5, %6 : vector<32x256xf32>
    %8 = arith.truncf %7 : vector<32x256xf32> to vector<32x256xbf16>
    %c0_6 = arith.constant 0 : index
    %c0_7 = arith.constant 0 : index
    %9 = vector.load %arg4[%c0_6, %c0_7] : memref<256x128xbf16, #tpu.memory_space<vmem>>, vector<256x128xbf16>
    %cst_8 = arith.constant dense<0.000000e+00> : vector<32x128xf32>
    %10 = tpu.matmul %8, %9, %cst_8 {dimension_numbers = #tpu.dot_dimension_numbers<[1], [0], [0], [1], [0, 0, 1, 1], [], []>} : vector<32x256xbf16>, vector<256x128xbf16>, vector<32x128xf32> -> vector<32x128xf32>
    %c0_9 = arith.constant 0 : index
    %c0_10 = arith.constant 0 : index
    %11 = vector.load %arg5[%c0_9, %c0_10] : memref<1x128xf32, #tpu.memory_space<vmem>>, vector<1x128xf32>
    %12 = vector.broadcast %11 : vector<1x128xf32> to vector<32x128xf32>
    %13 = arith.addf %10, %12 : vector<32x128xf32>
    %cst_11 = arith.constant 0.000000e+00 : f32
    %14 = vector.broadcast %cst_11 : f32 to vector<32x128xf32>
    %15 = arith.maximumf %13, %14 : vector<32x128xf32>
    %16 = arith.truncf %15 : vector<32x128xf32> to vector<32x128xbf16>
    %c0_12 = arith.constant 0 : index
    %c0_13 = arith.constant 0 : index
    %17 = vector.load %arg6[%c0_12, %c0_13] : memref<128x1xbf16, #tpu.memory_space<vmem>>, vector<128x1xbf16>
    %cst_14 = arith.constant dense<0.000000e+00> : vector<32x1xf32>
    %18 = tpu.matmul %16, %17, %cst_14 {dimension_numbers = #tpu.dot_dimension_numbers<[1], [0], [0], [1], [0, 0, 1, 1], [], []>} : vector<32x128xbf16>, vector<128x1xbf16>, vector<32x1xf32> -> vector<32x1xf32>
    %cst_15 = arith.constant 0.000000e+00 : f32
    %19 = vector.broadcast %cst_15 : f32 to vector<32x1xf32>
    %20 = arith.subf %19, %18 : vector<32x1xf32>
    %21 = math.exp %20 : vector<32x1xf32>
    %cst_16 = arith.constant 1.000000e+00 : f32
    %22 = vector.broadcast %cst_16 : f32 to vector<32x1xf32>
    %23 = arith.addf %22, %21 : vector<32x1xf32>
    %cst_17 = arith.constant 1.000000e+00 : f32
    %24 = vector.broadcast %cst_17 : f32 to vector<32x1xf32>
    %25 = arith.divf %24, %23 : vector<32x1xf32>
    %c0_18 = arith.constant 0 : index
    %c0_19 = arith.constant 0 : index
    %26 = vector.load %arg7[%c0_18, %c0_19] : memref<32x1xf32, #tpu.memory_space<vmem>>, vector<32x1xf32>
    tpu.vector_store %arg7[%c0_18, %c0_19], %25 {strides = array<i32>} : memref<32x1xf32, #tpu.memory_space<vmem>>, vector<32x1xf32>,
    return
  }
  func.func @transform_0(%arg0: i32) -> (i32, i32) {
    %c0_i32 = arith.constant 0 : i32
    %c0_i32_0 = arith.constant 0 : i32
    return %arg0, %c0_i32 : i32, i32
  }
  func.func @transform_1(%arg0: i32) -> (i32, i32) {
    %c0_i32 = arith.constant 0 : i32
    %c0_i32_0 = arith.constant 0 : i32
    %c0_i32_1 = arith.constant 0 : i32
    return %c0_i32, %c0_i32_0 : i32, i32
  }
  func.func @transform_2(%arg0: i32) -> (i32, i32) {
    %c0_i32 = arith.constant 0 : i32
    %c0_i32_0 = arith.constant 0 : i32
    %c0_i32_1 = arith.constant 0 : i32
    return %c0_i32, %c0_i32_0 : i32, i32
  }
  func.func @transform_3(%arg0: i32) -> (i32, i32) {
    %c0_i32 = arith.constant 0 : i32
    %c0_i32_0 = arith.constant 0 : i32
    %c0_i32_1 = arith.constant 0 : i32
    return %c0_i32, %c0_i32_0 : i32, i32
  }
  func.func @transform_4(%arg0: i32) -> (i32, i32) {
    %c0_i32 = arith.constant 0 : i32
    %c0_i32_0 = arith.constant 0 : i32
    %c0_i32_1 = arith.constant 0 : i32
    return %c0_i32, %c0_i32_0 : i32, i32
  }
  func.func @transform_5(%arg0: i32) -> (i32, i32) {
    %c0_i32 = arith.constant 0 : i32
    %c0_i32_0 = arith.constant 0 : i32
    %c0_i32_1 = arith.constant 0 : i32
    return %c0_i32, %c0_i32_0 : i32, i32
  }
  func.func @transform_6(%arg0: i32) -> (i32, i32) {
    %c0_i32 = arith.constant 0 : i32
    %c0_i32_0 = arith.constant 0 : i32
    return %arg0, %c0_i32 : i32, i32
  }
}

</mosaic_0001>

<bundles_post_ra>
// kernel: classify_forward.1
= control target key start
LH: loop header
LB: loop body
LE: loop exit
PB: predicated region body
PF: predicated region fallthrough
CT: control target
= control target key end

     0   :  { %vm960_vm3 = vcmask 7168   ;;  %s2067_s1 = inlined_call_operand.vmem [shape: bf16[512,256], index: 1, kind: input, shape index: {}]   ;;  %s2068_s0 = inlined_call_operand.vmem [shape: bf16[32,512], index: 0, kind: input, shape index: {}]   ;;  %s2069_s3 = inlined_call_operand.vmem [shape: bf16[256,128], index: 3, kind: input, shape index: {}]   ;;  %s2070_s4 = inlined_call_operand.vmem [shape: f32[1,128], index: 4, kind: input, shape index: {}]   ;;  %s2071_s2 = inlined_call_operand.vmem [shape: f32[1,256], index: 2, kind: input, shape index: {}]   ;;  %s2072_s5 = inlined_call_operand.vmem [shape: bf16[128,1], index: 5, kind: input, shape index: {}]   ;;  %s2073_s6 = inlined_call_operand.vmem [shape: f32[32,1], index: 6, kind: output, shape index: {}]  }
   0x1   :  { %v1059_v0 = vld [vmem:[%s2067_s1 + $0x70] sm:$0xf]  ;;  %v1376_v1 = vld [vmem:[%s2067_s1 + $0x74] sm:$0xf0]  ;;  %v1051_v11 = vld [vmem:[%s2067_s1 + $0x60] sm:$0xf] }
   0x2   :  { %v1123_v2 = vld [vmem:[%s2067_s1 + $0xf0] sm:$0xf]  ;;  %v1060_v3 = vor.u32 %v1376_v1, %v1059_v0  ;;  %v1392_v4 = vld [vmem:[%s2067_s1 + $0xf4] sm:$0xf0]  ;;  %v1374_v13 = vld [vmem:[%s2067_s1 + $0x64] sm:$0xf0] }
   0x3   :  { %v1187_v5 = vld [vmem:[%s2067_s1 + $0x170] sm:$0xf]  ;;  %v1408_v6 = vld [vmem:[%s2067_s1 + $0x174] sm:$0xf0]  ;;  %v1124_v7 = vor.u32 %v1392_v4, %v1123_v2  ;;  %v1115_v14 = vld [vmem:[%s2067_s1 + $0xe0] sm:$0xf]  ;;  %v1052_v16 = vor.u32 %v1374_v13, %v1051_v11 }
   0x4   :  { %v1188_v8 = vor.u32 %v1408_v6, %v1187_v5  ;;  %v1251_v9 = vld [vmem:[%s2067_s1 + $0x1f0] sm:$0xf]  ;;  %v1424_v10 = vld [vmem:[%s2067_s1 + $0x1f4] sm:$0xf0]  ;;  %461 = vmatpush.bf16.msra.mxu0 %v1060_v3  ;;  %v1390_v15 = vld [vmem:[%s2067_s1 + $0xe4] sm:$0xf0] }
   0x5   :  { %v1252_v12 = vor.u32 %v1424_v10, %v1251_v9  ;;  %480 = vmatpush.bf16.msra.mxu1 %v1124_v7  ;;  %v1116_v17 = vor.u32 %v1390_v15, %v1115_v14  ;;  %v1179_v18 = vld [vmem:[%s2067_s1 + $0x160] sm:$0xf]  ;;  %v1406_v19 = vld [vmem:[%s2067_s1 + $0x164] sm:$0xf0]  ;;  %v1043_v23 = vld [vmem:[%s2067_s1 + $0x50] sm:$0xf] }
   0x6   :  { %499 = vmatpush.bf16.msra.mxu2 %v1188_v8  ;;  %v1243_v20 = vld [vmem:[%s2067_s1 + $0x1e0] sm:$0xf]  ;;  %v1180_v21 = vor.u32 %v1406_v19, %v1179_v18  ;;  %v1422_v22 = vld [vmem:[%s2067_s1 + $0x1e4] sm:$0xf0]  ;;  %v1372_v24 = vld [vmem:[%s2067_s1 + $0x54] sm:$0xf0] }
   0x7   :  { %518 = vmatpush.bf16.msra.mxu3 %v1252_v12  ;;  %v1244_v25 = vor.u32 %v1422_v22, %v1243_v20  ;;  %v1107_v26 = vld [vmem:[%s2067_s1 + $0xd0] sm:$0xf]  ;;  %v1388_v27 = vld [vmem:[%s2067_s1 + $0xd4] sm:$0xf0]  ;;  %v1044_v29 = vor.u32 %v1372_v24, %v1043_v23  ;;  %v1035_v35 = vld [vmem:[%s2067_s1 + $0x40] sm:$0xf] }
   0x8   :  { %v1171_v28 = vld [vmem:[%s2067_s1 + $0x150] sm:$0xf]  ;;  %462 = vmatpush.bf16.msra.mxu0 %v1052_v16  ;;  %v1404_v30 = vld [vmem:[%s2067_s1 + $0x154] sm:$0xf0]  ;;  %v1108_v33 = vor.u32 %v1388_v27, %v1107_v26  ;;  %v1370_v36 = vld [vmem:[%s2067_s1 + $0x44] sm:$0xf0] }
   0x9   :  { %v1235_v31 = vld [vmem:[%s2067_s1 + $0x1d0] sm:$0xf]  ;;  %v1420_v32 = vld [vmem:[%s2067_s1 + $0x1d4] sm:$0xf0]  ;;  %481 = vmatpush.bf16.msra.mxu1 %v1116_v17  ;;  %v1172_v34 = vor.u32 %v1404_v30, %v1171_v28  ;;  %v1099_v37 = vld [vmem:[%s2067_s1 + $0xc0] sm:$0xf]  ;;  %v1036_v44 = vor.u32 %v1370_v36, %v1035_v35 }
   0xa   :  { %500 = vmatpush.bf16.msra.mxu2 %v1180_v21  ;;  %v1236_v38 = vor.u32 %v1420_v32, %v1235_v31  ;;  %v1386_v39 = vld [vmem:[%s2067_s1 + $0xc4] sm:$0xf0]  ;;  %v1163_v40 = vld [vmem:[%s2067_s1 + $0x140] sm:$0xf]  ;;  %v1027_v47 = vld [vmem:[%s2067_s1 + $0x30] sm:$0xf] }
   0xb   :  { %519 = vmatpush.bf16.msra.mxu3 %v1244_v25  ;;  %v1402_v41 = vld [vmem:[%s2067_s1 + $0x144] sm:$0xf0]  ;;  %v1227_v42 = vld [vmem:[%s2067_s1 + $0x1c0] sm:$0xf]  ;;  %v1100_v45 = vor.u32 %v1386_v39, %v1099_v37  ;;  %v1368_v48 = vld [vmem:[%s2067_s1 + $0x34] sm:$0xf0] }
   0xc   :  { %v1418_v43 = vld [vmem:[%s2067_s1 + $0x1c4] sm:$0xf0]  ;;  %463 = vmatpush.bf16.msra.mxu0 %v1044_v29  ;;  %v1164_v46 = vor.u32 %v1402_v41, %v1163_v40  ;;  %v1091_v49 = vld [vmem:[%s2067_s1 + $0xb0] sm:$0xf]  ;;  %v1384_v51 = vld [vmem:[%s2067_s1 + $0xb4] sm:$0xf0]  ;;  %v1028_v56 = vor.u32 %v1368_v48, %v1027_v47 }
   0xd   :  { %482 = vmatpush.bf16.msra.mxu1 %v1108_v33  ;;  %v1228_v50 = vor.u32 %v1418_v43, %v1227_v42  ;;  %v1155_v52 = vld [vmem:[%s2067_s1 + $0x130] sm:$0xf]  ;;  %v1400_v53 = vld [vmem:[%s2067_s1 + $0x134] sm:$0xf0]  ;;  %v1092_v57 = vor.u32 %v1384_v51, %v1091_v49  ;;  %v1019_v59 = vld [vmem:[%s2067_s1 + $0x20] sm:$0xf] }
   0xe   :  { %501 = vmatpush.bf16.msra.mxu2 %v1172_v34  ;;  %v1219_v54 = vld [vmem:[%s2067_s1 + $0x1b0] sm:$0xf]  ;;  %v1416_v55 = vld [vmem:[%s2067_s1 + $0x1b4] sm:$0xf0]  ;;  %v1156_v58 = vor.u32 %v1400_v53, %v1155_v52  ;;  %v1366_v60 = vld [vmem:[%s2067_s1 + $0x24] sm:$0xf0] }
   0xf   :  { %520 = vmatpush.bf16.msra.mxu3 %v1236_v38  ;;  %v1083_v61 = vld [vmem:[%s2067_s1 + $0xa0] sm:$0xf]  ;;  %v1220_v62 = vor.u32 %v1416_v55, %v1219_v54  ;;  %v1382_v63 = vld [vmem:[%s2067_s1 + $0xa4] sm:$0xf0]  ;;  %v1020_v4 = vor.u32 %v1366_v60, %v1019_v59  ;;  %v1011_v7 = vld [vmem:[%s2067_s1 + $0x10] sm:$0xf] }
  0x10   :  { %464 = vmatpush.bf16.msra.mxu0 %v1036_v44  ;;  %v1147_v0 = vld [vmem:[%s2067_s1 + $0x120] sm:$0xf]  ;;  %v1398_v1 = vld [vmem:[%s2067_s1 + $0x124] sm:$0xf0]  ;;  %v1084_v5 = vor.u32 %v1382_v63, %v1083_v61  ;;  %v1364_v8 = vld [vmem:[%s2067_s1 + $0x14] sm:$0xf0] }
  0x11   :  { %483 = vmatpush.bf16.msra.mxu1 %v1100_v45  ;;  %v1211_v2 = vld [vmem:[%s2067_s1 + $0x1a0] sm:$0xf]  ;;  %v1414_v3 = vld [vmem:[%s2067_s1 + $0x1a4] sm:$0xf0]  ;;  %v1148_v6 = vor.u32 %v1398_v1, %v1147_v0  ;;  %v1075_v9 = vld [vmem:[%s2067_s1 + $0x90] sm:$0xf]  ;;  %v1012_v17 = vor.u32 %v1364_v8, %v1011_v7 }
  0x12   :  { %502 = vmatpush.bf16.msra.mxu2 %v1164_v46  ;;  %v1212_v10 = vor.u32 %v1414_v3, %v1211_v2  ;;  %v1380_v11 = vld [vmem:[%s2067_s1 + $0x94] sm:$0xf0]  ;;  %v1139_v12 = vld [vmem:[%s2067_s1 + $0x110] sm:$0xf]  ;;  %v1003_v16 = vld [vmem:[%s2067_s1] sm:$0xf] }
  0x13   :  { %521 = vmatpush.bf16.msra.mxu3 %v1228_v50  ;;  %v1396_v13 = vld [vmem:[%s2067_s1 + $0x114] sm:$0xf0]  ;;  %v1203_v14 = vld [vmem:[%s2067_s1 + $0x190] sm:$0xf]  ;;  %v1362_v18 = vld [vmem:[%s2067_s1 + $0x4] sm:$0xf0]  ;;  %v1076_v21 = vor.u32 %v1380_v11, %v1075_v9 }
  0x14   :  { %465 = vmatpush.bf16.msra.mxu0 %v1028_v56  ;;  %v1412_v15 = vld [vmem:[%s2067_s1 + $0x194] sm:$0xf0]  ;;  %v1067_v19 = vld [vmem:[%s2067_s1 + $0x80] sm:$0xf]  ;;  %v1378_v20 = vld [vmem:[%s2067_s1 + $0x84] sm:$0xf0]  ;;  %v1140_v22 = vor.u32 %v1396_v13, %v1139_v12  ;;  %v1004_v34 = vor.u32 %v1362_v18, %v1003_v16 }
  0x15   :  { %484 = vmatpush.bf16.msra.mxu1 %v1092_v57  ;;  %v1131_v23 = vld [vmem:[%s2067_s1 + $0x100] sm:$0xf]  ;;  %v1394_v24 = vld [vmem:[%s2067_s1 + $0x104] sm:$0xf0]  ;;  %v1204_v26 = vor.u32 %v1412_v15, %v1203_v14  ;;  %v1355_v29 = vld [vmem:[%s2068_s0 + $0xc] sm:$0xf0]  ;;  %v1068_v38 = vor.u32 %v1378_v20, %v1067_v19 }
  0x16   :  { %503 = vmatpush.bf16.msra.mxu2 %v1156_v58  ;;  %v1195_v25 = vld [vmem:[%s2067_s1 + $0x180] sm:$0xf]  ;;  %v1410_v27 = vld [vmem:[%s2067_s1 + $0x184] sm:$0xf0]  ;;  %v1353_v30 = vld [vmem:[%s2068_s0 + $0x4] sm:$0xf]  ;;  %v1132_v39 = vor.u32 %v1394_v24, %v1131_v23 }
  0x17   :  { %522 = vmatpush.bf16.msra.mxu3 %v1220_v62  ;;  %v971_v28 = vld [vmem:[%s2068_s0] sm:$0xf]  ;;  %v973_v31 = vld [vmem:[%s2068_s0 + $0x10] sm:$0xf0]  ;;  %v1189_v33 = vld [vmem:[%s2067_s1 + $0x178] sm:$0xf0]  ;;  %v1196_v43 = vor.u32 %v1410_v27, %v1195_v25 }
  0x18   :  { %466 = vmatpush.bf16.msra.mxu0 %v1020_v4  ;;  %v1407_v32 = vld [vmem:[%s2067_s1 + $0x174] sm:$0xf]  ;;  %v979_v35 = vld [vmem:[%s2068_s0 + $0x8] sm:$0xf]  ;;  %v1125_v37 = vld [vmem:[%s2067_s1 + $0xf8] sm:$0xf0]  ;;  %v1746_v48 = vor.u32 %v1355_v29, %v971_v28  ;;  %v1757_v53 = vor.u32 %v1353_v30, %v973_v31 }
  0x19   :  { %485 = vmatpush.bf16.msra.mxu1 %v1084_v5  ;;  %v1391_v36 = vld [vmem:[%s2067_s1 + $0xf4] sm:$0xf]  ;;  %v1356_v40 = vld [vmem:[%s2068_s0 + $0x14] sm:$0xf0]  ;;  %v1354_v41 = vld [vmem:[%s2068_s0 + $0xc] sm:$0xf]  ;;  %v1192_v44 = vor.u32 %v1407_v32, %v1189_v33 }
  0x1a   :  { %504 = vmatpush.bf16.msra.mxu2 %v1148_v6  ;;  %v981_v42 = vld [vmem:[%s2068_s0 + $0x18] sm:$0xf0]  ;;  %v1375_v45 = vld [vmem:[%s2067_s1 + $0x74] sm:$0xf]  ;;  %v1128_v49 = vor.u32 %v1391_v36, %v1125_v37  ;;  %v1405_v51 = vld [vmem:[%s2067_s1 + $0x164] sm:$0xf]  ;;  %v1759_v54 = vor.u32 %v1356_v40, %v979_v35 }
  0x1b   :  { %523 = vmatpush.bf16.msra.mxu3 %v1212_v10  ;;  %v1061_v46 = vld [vmem:[%s2067_s1 + $0x78] sm:$0xf0]  ;;  %v1423_v47 = vld [vmem:[%s2067_s1 + $0x1f4] sm:$0xf]  ;;  %v1181_v52 = vld [vmem:[%s2067_s1 + $0x168] sm:$0xf0]  ;;  %v1767_v57 = vor.u32 %v1354_v41, %v981_v42 }
  0x1c   :  { %467 = vmatpush.bf16.msra.mxu0 %v1012_v17  ;;  %v1253_v50 = vld [vmem:[%s2067_s1 + $0x1f8] sm:$0xf0]  ;;  %v1389_v55 = vld [vmem:[%s2067_s1 + $0xe4] sm:$0xf]  ;;  %v1117_v56 = vld [vmem:[%s2067_s1 + $0xe8] sm:$0xf0]  ;;  %v1064_v58 = vor.u32 %v1375_v45, %v1061_v46  ;;  %v1184_v60 = vor.u32 %v1405_v51, %v1181_v52 }
  0x1d   :  { %486 = vmatpush.bf16.msra.mxu1 %v1076_v21  ;;  %v1256_v59 = vor.u32 %v1423_v47, %v1253_v50  ;;  %v1373_v61 = vld [vmem:[%s2067_s1 + $0x64] sm:$0xf]  ;;  %v1053_v62 = vld [vmem:[%s2067_s1 + $0x68] sm:$0xf0]  ;;  %v1120_v0 = vor.u32 %v1389_v55, %v1117_v56  ;;  %v1403_v2 = vld [vmem:[%s2067_s1 + $0x154] sm:$0xf] }
  0x1e   :  { %505 = vmatpush.bf16.msra.mxu2 %v1140_v22  ;;  %v1421_v63 = vld [vmem:[%s2067_s1 + $0x1e4] sm:$0xf]  ;;  %v1245_v1 = vld [vmem:[%s2067_s1 + $0x1e8] sm:$0xf0]  ;;  %v1173_v3 = vld [vmem:[%s2067_s1 + $0x158] sm:$0xf0]  ;;  %v1056_v6 = vor.u32 %v1373_v61, %v1053_v62 }
  0x1f   :  { %524 = vmatpush.bf16.msra.mxu3 %v1204_v26  ;;  %v1387_v4 = vld [vmem:[%s2067_s1 + $0xd4] sm:$0xf]  ;;  %v1109_v5 = vld [vmem:[%s2067_s1 + $0xd8] sm:$0xf0]  ;;  %v1248_v7 = vor.u32 %v1421_v63, %v1245_v1  ;;  %v1176_v8 = vor.u32 %v1403_v2, %v1173_v3  ;;  %v1401_v14 = vld [vmem:[%s2067_s1 + $0x144] sm:$0xf] }
  0x20   :  { %468 = vmatpush.bf16.msra.mxu0 %v1004_v34  ;;  %v1371_v9 = vld [vmem:[%s2067_s1 + $0x54] sm:$0xf]  ;;  %v1045_v10 = vld [vmem:[%s2067_s1 + $0x58] sm:$0xf0]  ;;  %v1112_v12 = vor.u32 %v1387_v4, %v1109_v5  ;;  %v1165_v15 = vld [vmem:[%s2067_s1 + $0x148] sm:$0xf0] }
  0x21   :  { %487 = vmatpush.bf16.msra.mxu1 %v1068_v38  ;;  %v1419_v11 = vld [vmem:[%s2067_s1 + $0x1d4] sm:$0xf]  ;;  %v1237_v13 = vld [vmem:[%s2067_s1 + $0x1d8] sm:$0xf0]  ;;  %v1385_v16 = vld [vmem:[%s2067_s1 + $0xc4] sm:$0xf]  ;;  %v1048_v18 = vor.u32 %v1371_v9, %v1045_v10  ;;  %v1168_v23 = vor.u32 %v1401_v14, %v1165_v15 }
  0x22   :  { %506 = vmatpush.bf16.msra.mxu2 %v1132_v39  ;;  %v1101_v17 = vld [vmem:[%s2067_s1 + $0xc8] sm:$0xf0]  ;;  %v1369_v19 = vld [vmem:[%s2067_s1 + $0x44] sm:$0xf]  ;;  %v1240_v22 = vor.u32 %v1419_v11, %v1237_v13  ;;  %v987_v25 = vld [vmem:[%s2068_s0 + $0x20] sm:$0xf] }
  0x23   :  { %525 = vmatpush.bf16.msra.mxu3 %v1196_v43  ;;  %469 = vmatmul.bf16.vlgmr.msra.gmra.mxu0 %v1746_v48  ;;  %v1037_v20 = vld [vmem:[%s2067_s1 + $0x48] sm:$0xf0]  ;;  %v1417_v21 = vld [vmem:[%s2067_s1 + $0x1c4] sm:$0xf]  ;;  %v1359_v26 = vld [vmem:[%s2068_s0 + $0x2c] sm:$0xf0]  ;;  %v1104_v27 = vor.u32 %v1385_v16, %v1101_v17 }
  0x24   :  { %488 = vmatmul.bf16.vlgmr.msra.gmra.mxu1 %v1757_v53  ;;  %537 = vmatpush.bf16.msrb.mxu0 %v1064_v58  ;;  %v1229_v24 = vld [vmem:[%s2067_s1 + $0x1c8] sm:$0xf0]  ;;  %v1357_v28 = vld [vmem:[%s2068_s0 + $0x24] sm:$0xf]  ;;  %v989_v29 = vld [vmem:[%s2068_s0 + $0x30] sm:$0xf0]  ;;  %v1040_v35 = vor.u32 %v1369_v19, %v1037_v20 }
  0x25   :  { %556 = vmatpush.bf16.msrb.mxu1 %v1128_v49  ;;  %507 = vmatmul.bf16.vlgmr.msra.gmra.mxu2 %v1759_v54  ;;  %v1399_v30 = vld [vmem:[%s2067_s1 + $0x134] sm:$0xf]  ;;  %v1157_v31 = vld [vmem:[%s2067_s1 + $0x138] sm:$0xf0]  ;;  %v995_v32 = vld [vmem:[%s2068_s0 + $0x28] sm:$0xf]  ;;  %v1232_v39 = vor.u32 %v1417_v21, %v1229_v24  ;;  %v1889_v50 = vor.u32 %v1357_v28, %v989_v29 }
  0x26   :  { %575 = vmatpush.bf16.msrb.mxu2 %v1192_v44  ;;  %526 = vmatmul.bf16.vlgmr.msra.gmra.mxu3 %v1767_v57  ;;  %v1383_v33 = vld [vmem:[%s2067_s1 + $0xb4] sm:$0xf]  ;;  %v1093_v34 = vld [vmem:[%s2067_s1 + $0xb8] sm:$0xf0]  ;;  %v1360_v36 = vld [vmem:[%s2068_s0 + $0x34] sm:$0xf0]  ;;  %v1160_v40 = vor.u32 %v1399_v30, %v1157_v31  ;;  %v1878_v44 = vor.u32 %v1359_v26, %v987_v25 }
  0x27   :  { %594 = vmatpush.bf16.msrb.mxu3 %v1256_v59  ;;  %v1358_v37 = vld [vmem:[%s2068_s0 + $0x2c] sm:$0xf]  ;;  %v997_v38 = vld [vmem:[%s2068_s0 + $0x38] sm:$0xf0]  ;;  %v1367_v41 = vld [vmem:[%s2067_s1 + $0x34] sm:$0xf]  ;;  %v1096_v45 = vor.u32 %v1383_v33, %v1093_v34  ;;  %v1891_v51 = vor.u32 %v1360_v36, %v995_v32 }
  0x28   :  { %538 = vmatpush.bf16.msrb.mxu0 %v1056_v6  ;;  %v1029_v42 = vld [vmem:[%s2067_s1 + $0x38] sm:$0xf0]  ;;  %v1415_v43 = vld [vmem:[%s2067_s1 + $0x1b4] sm:$0xf]  ;;  %v1397_v47 = vld [vmem:[%s2067_s1 + $0x124] sm:$0xf]  ;;  %v1899_v56 = vor.u32 %v1358_v37, %v997_v38 }
  0x29   :  { %557 = vmatpush.bf16.msrb.mxu1 %v1120_v0  ;;  %v1221_v46 = vld [vmem:[%s2067_s1 + $0x1b8] sm:$0xf0]  ;;  %v1149_v49 = vld [vmem:[%s2067_s1 + $0x128] sm:$0xf0]  ;;  %v1381_v52 = vld [vmem:[%s2067_s1 + $0xa4] sm:$0xf]  ;;  %v1032_v58 = vor.u32 %v1367_v41, %v1029_v42 }
  0x2a   :  { %576 = vmatpush.bf16.msrb.mxu2 %v1184_v60  ;;  %v1085_v55 = vld [vmem:[%s2067_s1 + $0xa8] sm:$0xf0]  ;;  %v1224_v59 = vor.u32 %v1415_v43, %v1221_v46  ;;  %v1152_v60 = vor.u32 %v1397_v47, %v1149_v49  ;;  %v1365_v61 = vld [vmem:[%s2067_s1 + $0x24] sm:$0xf]  ;;  %v1395_v2 = vld [vmem:[%s2067_s1 + $0x114] sm:$0xf] }
  0x2b   :  { %595 = vmatpush.bf16.msrb.mxu3 %v1248_v7  ;;  %v1021_v62 = vld [vmem:[%s2067_s1 + $0x28] sm:$0xf0]  ;;  %v1413_v63 = vld [vmem:[%s2067_s1 + $0x1a4] sm:$0xf]  ;;  %v1088_v0 = vor.u32 %v1381_v52, %v1085_v55  ;;  %v1141_v3 = vld [vmem:[%s2067_s1 + $0x118] sm:$0xf0] }
  0x2c   :  { %539 = vmatpush.bf16.msrb.mxu0 %v1048_v18  ;;  %v1213_v1 = vld [vmem:[%s2067_s1 + $0x1a8] sm:$0xf0]  ;;  %v1379_v4 = vld [vmem:[%s2067_s1 + $0x94] sm:$0xf]  ;;  %v1077_v5 = vld [vmem:[%s2067_s1 + $0x98] sm:$0xf0]  ;;  %v1024_v6 = vor.u32 %v1365_v61, %v1021_v62 }
  0x2d   :  { %558 = vmatpush.bf16.msrb.mxu1 %v1112_v12  ;;  %v1216_v7 = vor.u32 %v1413_v63, %v1213_v1  ;;  %v1363_v9 = vld [vmem:[%s2067_s1 + $0x14] sm:$0xf]  ;;  %v1013_v10 = vld [vmem:[%s2067_s1 + $0x18] sm:$0xf0]  ;;  %v1080_v12 = vor.u32 %v1379_v4, %v1077_v5  ;;  %v1393_v14 = vld [vmem:[%s2067_s1 + $0x104] sm:$0xf] }
  0x2e   :  { %577 = vmatpush.bf16.msrb.mxu2 %v1176_v8  ;;  %v1144_v8 = vor.u32 %v1395_v2, %v1141_v3  ;;  %v1411_v11 = vld [vmem:[%s2067_s1 + $0x194] sm:$0xf]  ;;  %v1205_v13 = vld [vmem:[%s2067_s1 + $0x198] sm:$0xf0]  ;;  %v1133_v15 = vld [vmem:[%s2067_s1 + $0x108] sm:$0xf0]  ;;  %v1016_v18 = vor.u32 %v1363_v9, %v1013_v10 }
  0x2f   :  { %596 = vmatpush.bf16.msrb.mxu3 %v1240_v22  ;;  %v1377_v16 = vld [vmem:[%s2067_s1 + $0x84] sm:$0xf]  ;;  %v1069_v17 = vld [vmem:[%s2067_s1 + $0x88] sm:$0xf0]  ;;  %v1208_v19 = vor.u32 %v1411_v11, %v1205_v13  ;;  %v1136_v20 = vor.u32 %v1393_v14, %v1133_v15  ;;  %v1432_v28 = vld [vmem:[%s2069_s3 + $0x38] sm:$0xff] }
  0x30   :  { %540 = vmatpush.bf16.msrb.mxu0 %v1040_v35  ;;  %v1361_v21 = vld [vmem:[%s2067_s1 + $0x4] sm:$0xf]  ;;  %v1005_v22 = vld [vmem:[%s2067_s1 + $0x8] sm:$0xf0]  ;;  %v1431_v29 = vld [vmem:[%s2069_s3 + $0x30] sm:$0xff] }
  0x31   :  { %559 = vmatpush.bf16.msrb.mxu1 %v1104_v27  ;;  %v1409_v24 = vld [vmem:[%s2067_s1 + $0x184] sm:$0xf]  ;;  %v1197_v25 = vld [vmem:[%s2067_s1 + $0x188] sm:$0xf0]  ;;  %v1008_v26 = vor.u32 %v1361_v21, %v1005_v22  ;;  %v1440_v32 = vld [vmem:[%s2069_s3 + $0x78] sm:$0xff] }
  0x32   :  { %578 = vmatpush.bf16.msrb.mxu2 %v1168_v23  ;;  %v1072_v23 = vor.u32 %v1377_v16, %v1069_v17  ;;  %v1200_v27 = vor.u32 %v1409_v24, %v1197_v25  ;;  %v1426_v30 = vld [vmem:[%s2069_s3 + $0x8] sm:$0xff]  ;;  %v1425_v31 = vld [vmem:[%s2069_s3] sm:$0xff]  ;;  %v1439_v33 = vld [vmem:[%s2069_s3 + $0x70] sm:$0xff] }
  0x33   :  { %597 = vmatpush.bf16.msrb.mxu3 %v1232_v39  ;;  %474 = vmatmul.bf16.gmra.mxu0 %v1878_v44  ;;  %v95_v34 = vld [vmem:[%s2071_s2] sm:$0x3]  ;;  %v1438_v37 = vld [vmem:[%s2069_s3 + $0x68] sm:$0xff] }
  0x34   :  { %493 = vmatmul.bf16.gmra.mxu1 %v1889_v50  ;;  %541 = vmatpush.bf16.msrb.mxu0 %v1032_v58  ;;  %v97_v35 = vperm.slane %v95_v34, 0  ;;  %v1433_v2 = vld [vmem:[%s2069_s3 + $0x40] sm:$0xff]  ;;  %v98_v16 = vperm.slane %v95_v34, 1 }
  0x35   :  { %560 = vmatpush.bf16.msrb.mxu1 %v1096_v45  ;;  %512 = vmatmul.bf16.gmra.mxu2 %v1891_v51  ;;  %v1436_v45 = vld [vmem:[%s2069_s3 + $0x58] sm:$0xff] }
  0x36   :  { %579 = vmatpush.bf16.msrb.mxu2 %v1160_v40  ;;  %531 = vmatmul.bf16.gmra.mxu3 %v1899_v56  ;;  %v1437_v40 = vld [vmem:[%s2069_s3 + $0x60] sm:$0xff] }
  0x37   :  { %598 = vmatpush.bf16.msrb.mxu3 %v1224_v59 }
  0x38   :  { %542 = vmatpush.bf16.msrb.mxu0 %v1024_v6 }
  0x39   :  { %561 = vmatpush.bf16.msrb.mxu1 %v1088_v0 }
  0x3a   :  { %580 = vmatpush.bf16.msrb.mxu2 %v1152_v60  ;;  %v1434_v60 = vld [vmem:[%s2069_s3 + $0x48] sm:$0xff] }
  0x3b   :  { %599 = vmatpush.bf16.msrb.mxu3 %v1216_v7 }
  0x3c   :  { %543 = vmatpush.bf16.msrb.mxu0 %v1016_v18 }
  0x3d   :  { %562 = vmatpush.bf16.msrb.mxu1 %v1080_v12 }
  0x3e   :  { %581 = vmatpush.bf16.msrb.mxu2 %v1144_v8 }
  0x3f   :  { %600 = vmatpush.bf16.msrb.mxu3 %v1208_v19 }
  0x40   :  { %544 = vmatpush.bf16.msrb.mxu0 %v1008_v26 }
  0x41   :  { %563 = vmatpush.bf16.msrb.mxu1 %v1072_v23 }
  0x42   :  { %582 = vmatpush.bf16.msrb.mxu2 %v1136_v20 }
  0x43   :  { %601 = vmatpush.bf16.msrb.mxu3 %v1200_v27  ;;  %545 = vmatmul.bf16.vlgmr.msrb.gmra.mxu0 %v1746_v48  ;;  %v1430_v48 = vld [vmem:[%s2069_s3 + $0x28] sm:$0xff] }
  0x44   :  { %757 = vmatpush.bf16.msra.mxu0 %v1432_v28  ;;  %564 = vmatmul.bf16.vlgmr.msrb.gmra.mxu1 %v1757_v53  ;;  %v1429_v53 = vld [vmem:[%s2069_s3 + $0x20] sm:$0xff] }
  0x45   :  { %583 = vmatmul.bf16.vlgmr.msrb.gmra.mxu2 %v1759_v54  ;;  %v1428_v54 = vld [vmem:[%s2069_s3 + $0x18] sm:$0xff]  ;;  %776 = vmatpush.bf16.msra.mxu1 %v1440_v32 }
  0x46   :  { %602 = vmatmul.bf16.vlgmr.msrb.gmra.mxu3 %v1767_v57  ;;  %v1427_v57 = vld [vmem:[%s2069_s3 + $0x10] sm:$0xff] }
  0x47   :  { %1449 = vmatpush.bf16.msra.mxu3 %v1432_v28 }
  0x48   :  { %758 = vmatpush.bf16.msra.mxu0 %v1431_v29 }
  0x49   :  { %777 = vmatpush.bf16.msra.mxu1 %v1439_v33 }
  0x4b   :  { %1450 = vmatpush.bf16.msra.mxu3 %v1431_v29 }
  0x4c   :  { %759 = vmatpush.bf16.msra.mxu0 %v1430_v48 }
  0x4d   :  { %778 = vmatpush.bf16.msra.mxu1 %v1438_v37 }
  0x4f   :  { %1451 = vmatpush.bf16.msra.mxu3 %v1430_v48 }
  0x50   :  { %760 = vmatpush.bf16.msra.mxu0 %v1429_v53 }
  0x51   :  { %779 = vmatpush.bf16.msra.mxu1 %v1437_v40 }
  0x53   :  { %550 = vmatmul.bf16.gmra.mxu0 %v1878_v44  ;;  %1452 = vmatpush.bf16.msra.mxu3 %v1429_v53 }
  0x54   :  { %569 = vmatmul.bf16.gmra.mxu1 %v1889_v50  ;;  %761 = vmatpush.bf16.msra.mxu0 %v1428_v54  ;;  %v1435_v50 = vld [vmem:[%s2069_s3 + $0x50] sm:$0xff] }
  0x55   :  { %588 = vmatmul.bf16.gmra.mxu2 %v1891_v51  ;;  %780 = vmatpush.bf16.msra.mxu1 %v1436_v45 }
  0x56   :  { %607 = vmatmul.bf16.gmra.mxu3 %v1899_v56 }
  0x57   :  { %1453 = vmatpush.bf16.msra.mxu3 %v1428_v54 }
  0x58   :  { %762 = vmatpush.bf16.msra.mxu0 %v1427_v57 }
  0x59   :  { %781 = vmatpush.bf16.msra.mxu1 %v1435_v50 }
  0x5b   :  { %1454 = vmatpush.bf16.msra.mxu3 %v1427_v57 }
  0x5c   :  { %763 = vmatpush.bf16.msra.mxu0 %v1426_v30 }
  0x5d   :  { %782 = vmatpush.bf16.msra.mxu1 %v1434_v60  ;;  %v1447_v60 = vld [vmem:[%s2072_s5 + $0x30] sm:$0xff] }
  0x5f   :  { %1455 = vmatpush.bf16.msra.mxu3 %v1426_v30 }
  0x60   :  { %764 = vmatpush.bf16.msra.mxu0 %v1425_v31 }
  0x61   :  { %783 = vmatpush.bf16.msra.mxu1 %v1433_v2  ;;  %v1441_v2 = vld [vmem:[%s2072_s5] sm:$0xff] }
  0x63   :  { %1456 = vmatpush.bf16.msra.mxu3 %v1425_v31 }
  0xa0   :  { %v470_v36 = vpop.f32.mrf.mxu0 }
  0xa1   :  { %v489_v38 = vpop.f32.mrf.mxu1  ;;  %v471_v39 = vadd.f32 %v470_v36, %v97_v35 }
  0xa3   :  { %v490_v42 = vadd.f32 %v489_v38, %v471_v39 }
  0xa8   :  { %v508_v41 = vpop.f32.mrf.mxu2  ;;  %v472_v44 = vpop.f32.mrf.mxu0 }
  0xa9   :  { %v527_v43 = vpop.f32.mrf.mxu3  ;;  %v491_v46 = vpop.f32.mrf.mxu1  ;;  %v473_v47 = vadd.f32 %v472_v44, %v97_v35  ;;  %v509_v49 = vadd.f32 %v508_v41, %v490_v42 }
  0xab   :  { %v492_v51 = vadd.f32 %v491_v46, %v473_v47  ;;  %v528_v55 = vadd.f32 %v527_v43, %v509_v49 }
  0xad   :  { %v613_v63 = vmax.f32 %v528_v55, 0.0 }
  0xb0   :  { %v510_v52 = vpop.f32.mrf.mxu2  ;;  %v475_v59 = vpop.f32.mrf.mxu0 }
  0xb1   :  { %v511_v56 = vadd.f32 %v510_v52, %v492_v51  ;;  %v529_v58 = vpop.f32.mrf.mxu3  ;;  %v494_v61 = vpop.f32.mrf.mxu1  ;;  %v476_v1 = vadd.f32 %v475_v59, %v97_v35  ;;  %v1448_v59 = vld [vmem:[%s2072_s5 + $0x38] sm:$0xff] }
  0xb2   :  { %865 = vmatpush.bf16.msra.mxu2 %v1448_v59 }
  0xb3   :  { %v530_v62 = vadd.f32 %v529_v58, %v511_v56  ;;  %v495_v5 = vadd.f32 %v494_v61, %v476_v1  ;;  %v1446_v61 = vld [vmem:[%s2072_s5 + $0x28] sm:$0xff] }
  0xb4   :  { %v1442_v1 = vld [vmem:[%s2072_s5 + $0x8] sm:$0xff] }
  0xb5   :  { %v615_v0 = vmax.f32 %v530_v62, 0.0  ;;  %v1445_v62 = vld [vmem:[%s2072_s5 + $0x20] sm:$0xff] }
  0xb6   :  { %866 = vmatpush.bf16.msra.mxu2 %v1447_v60 }
  0xb7   :  { %v621_v3 = vpack.c.bf16 %v615_v0, %v613_v63  ;;  %v1444_v63 = vld [vmem:[%s2072_s5 + $0x18] sm:$0xff]  ;;  %v1443_v0 = vld [vmem:[%s2072_s5 + $0x10] sm:$0xff] }
  0xb8   :  { %v513_v4 = vpop.f32.mrf.mxu2  ;;  %v477_v7 = vpop.f32.mrf.mxu0 }
  0xb9   :  { %v532_v6 = vpop.f32.mrf.mxu3  ;;  %765 = vmatmul.bf16.vlgmr.msra.gmra.mxu0 %v621_v3  ;;  %v496_v8 = vpop.f32.mrf.mxu1  ;;  %v478_v9 = vadd.f32 %v477_v7, %v97_v35  ;;  %v514_v10 = vadd.f32 %v513_v4, %v495_v5  ;;  %v1457_v5 = vld [vmem:[%s2070_s4] ss:$0 sm:$0xff] }
  0xba   :  { %867 = vmatpush.bf16.msra.mxu2 %v1446_v61 }
  0xbb   :  { %v497_v11 = vadd.f32 %v496_v8, %v478_v9  ;;  %v533_v13 = vadd.f32 %v532_v6, %v514_v10 }
  0xbd   :  { %v617_v20 = vmax.f32 %v533_v13, 0.0 }
  0xbe   :  { %868 = vmatpush.bf16.msra.mxu2 %v1445_v62 }
  0xc0   :  { %v515_v12 = vpop.f32.mrf.mxu2  ;;  %v546_v17 = vpop.f32.mrf.mxu0 }
  0xc1   :  { %v516_v14 = vadd.f32 %v515_v12, %v497_v11  ;;  %v534_v15 = vpop.f32.mrf.mxu3  ;;  %v565_v18 = vpop.f32.mrf.mxu1  ;;  %v547_v22 = vadd.f32 %v546_v17, %v98_v16 }
  0xc2   :  { %869 = vmatpush.bf16.msra.mxu2 %v1444_v63 }
  0xc3   :  { %v535_v19 = vadd.f32 %v534_v15, %v516_v14  ;;  %v566_v26 = vadd.f32 %v565_v18, %v547_v22 }
  0xc5   :  { %v619_v21 = vmax.f32 %v535_v19, 0.0 }
  0xc6   :  { %870 = vmatpush.bf16.msra.mxu2 %v1443_v0 }
  0xc7   :  { %v623_v23 = vpack.c.bf16 %v619_v21, %v617_v20 }
  0xc8   :  { %v584_v24 = vpop.f32.mrf.mxu2  ;;  %v548_v27 = vpop.f32.mrf.mxu0 }
  0xc9   :  { %v603_v25 = vpop.f32.mrf.mxu3  ;;  %770 = vmatmul.bf16.vlgmr.msra.gmra.mxu3 %v623_v23  ;;  %v567_v28 = vpop.f32.mrf.mxu1  ;;  %v549_v29 = vadd.f32 %v548_v27, %v98_v16  ;;  %v585_v48 = vadd.f32 %v584_v24, %v566_v26 }
  0xca   :  { %871 = vmatpush.bf16.msra.mxu2 %v1442_v1 }
  0xcb   :  { %v568_v53 = vadd.f32 %v567_v28, %v549_v29  ;;  %v604_v30 = vadd.f32 %v603_v25, %v585_v48 }
  0xcd   :  { %v614_v35 = vmax.f32 %v604_v30, 0.0 }
  0xce   :  { %872 = vmatpush.bf16.msra.mxu2 %v1441_v2 }
  0xd0   :  { %v586_v54 = vpop.f32.mrf.mxu2  ;;  %v551_v32 = vpop.f32.mrf.mxu0 }
  0xd1   :  { %v605_v57 = vpop.f32.mrf.mxu3  ;;  %v587_v31 = vadd.f32 %v586_v54, %v568_v53  ;;  %v570_v34 = vpop.f32.mrf.mxu1  ;;  %v552_v37 = vadd.f32 %v551_v32, %v98_v16 }
  0xd3   :  { %v606_v33 = vadd.f32 %v605_v57, %v587_v31  ;;  %v571_v41 = vadd.f32 %v570_v34, %v552_v37 }
  0xd5   :  { %v616_v36 = vmax.f32 %v606_v33, 0.0 }
  0xd7   :  { %v622_v38 = vpack.c.bf16 %v616_v36, %v614_v35 }
  0xd8   :  { %v589_v39 = vpop.f32.mrf.mxu2  ;;  %v553_v42 = vpop.f32.mrf.mxu0 }
  0xd9   :  { %v608_v40 = vpop.f32.mrf.mxu3  ;;  %784 = vmatmul.bf16.vlgmr.msra.gmra.mxu1 %v622_v38  ;;  %v554_v43 = vadd.f32 %v553_v42, %v98_v16  ;;  %v590_v44 = vadd.f32 %v589_v39, %v571_v41  ;;  %v572_v45 = vpop.f32.mrf.mxu1 }
  0xdb   :  { %v573_v46 = vadd.f32 %v572_v45, %v554_v43  ;;  %v609_v49 = vadd.f32 %v608_v40, %v590_v44 }
  0xdd   :  { %v618_v55 = vmax.f32 %v609_v49, 0.0 }
  0xe0   :  { %v591_v47 = vpop.f32.mrf.mxu2 }
  0xe1   :  { %v592_v50 = vadd.f32 %v591_v47, %v573_v46  ;;  %v610_v51 = vpop.f32.mrf.mxu3 }
  0xe3   :  { %v611_v52 = vadd.f32 %v610_v51, %v592_v50 }
  0xe5   :  { %v620_v56 = vmax.f32 %v611_v52, 0.0 }
  0xe7   :  { %v624_v58 = vpack.c.bf16 %v620_v56, %v618_v55 }
  0xe9   :  { %789 = vmatmul.bf16.gmra.mxu1 %v624_v58 }
 0x136   :  { %v766_v3 = vpop.f32.mrf.mxu0 }
 0x137   :  { %v767_v7 = vadd.f32 %v1457_v5, %v766_v3 }
 0x13e   :  { %v768_v6 = vpop.f32.mrf.mxu0 }
 0x13f   :  { %v769_v8 = vadd.f32 %v1457_v5, %v768_v6 }
 0x14c   :  { %v771_v12 = vpop.f32.mrf.mxu3 }
 0x14d   :  { %v772_v18 = vadd.f32 %v1457_v5, %v771_v12 }
 0x154   :  { %v773_v17 = vpop.f32.mrf.mxu3 }
 0x155   :  { %v774_v19 = vadd.f32 %v1457_v5, %v773_v17 }
 0x156   :  { %v785_v4 = vpop.f32.mrf.mxu1 }
 0x157   :  { %v786_v9 = vadd.f32 %v785_v4, %v767_v7 }
 0x159   :  { %v795_v13 = vmax.f32 %v786_v9, 0.0 }
 0x15e   :  { %v787_v10 = vpop.f32.mrf.mxu1 }
 0x15f   :  { %v788_v11 = vadd.f32 %v787_v10, %v769_v8 }
 0x161   :  { %v796_v14 = vmax.f32 %v788_v11, 0.0 }
 0x163   :  { %v799_v15 = vpack.c.bf16 %v796_v14, %v795_v13 }
 0x165   :  { %873 = vmatmul.bf16.vlgmr.msra.gmra.mxu2 %v799_v15 }
 0x166   :  { %v790_v16 = vpop.f32.mrf.mxu1 }
 0x167   :  { %v791_v20 = vadd.f32 %v790_v16, %v772_v18 }
 0x169   :  { %v797_v23 = vmax.f32 %v791_v20, 0.0 }
 0x16e   :  { %v792_v21 = vpop.f32.mrf.mxu1 }
 0x16f   :  { %v793_v22 = vadd.f32 %v792_v21, %v774_v19 }
 0x171   :  { %v798_v24 = vmax.f32 %v793_v22, 0.0 }
 0x173   :  { %v800_v25 = vpack.c.bf16 %v798_v24, %v797_v23 }
 0x175   :  { %878 = vmatmul.bf16.gmra.mxu2 %v800_v25 }
 0x1e8   :  { %v874_v26 = vpop.f32.mrf.mxu2 }
 0x1e9   :  { %v884_v27 = vsub.f32 0.0, %v874_v26 }
 0x1eb   :  { %v888_v28 = vmul.f32 1.442695, %v884_v27 }
 0x1ed   :  { %1458 = vpow2.f32 %v888_v28 }
 0x1f0   :  { %v876_v29 = vpop.f32.mrf.mxu2 }
 0x1f1   :  { %v885_v48 = vsub.f32 0.0, %v876_v29 }
 0x1f3   :  { %v1459_v53 = vpop.eup %1458  ;;  %v890_v54 = vmul.f32 1.442695, %v885_v48 }
 0x1f4   :  { %v896_v57 = vadd.f32 1.0, %v1459_v53 }
 0x1f5   :  { %1460 = vpow2.f32 %v890_v54 }
 0x1f6   :  { %1462 = vrcp.f32 %v896_v57  ;;  %v911_v38 = vand.u32 2147483648, %v896_v57  ;;  %v909_v41 = vand.u32 2147483647, %v896_v57  ;;  %vm905_vm1 = vweird.f32 %v896_v57 }
 0x1f8   :  { %v879_v30 = vpop.f32.mrf.mxu2  ;;  %v912_v47 = vor.u32 1.1754944e-38, %v911_v38  ;;  %vm910_vm4 = vcmp.eq.f32.partialorder %v909_v41, 8.507059e+37 }
 0x1f9   :  { %v886_v31 = vsub.f32 0.0, %v879_v30 }
 0x1fb   :  { %v1461_v32 = vpop.eup %1460  ;;  %v892_v33 = vmul.f32 1.442695, %v886_v31 }
 0x1fc   :  { %v1463_v34 = vpop.eup %1462  ;;  %v897_v35 = vadd.f32 1.0, %v1461_v32 }
 0x1fd   :  { %v901_v36 = vmul.f32 %v1463_v34, %v896_v57  ;;  %1464 = vpow2.f32 %v892_v33  ;;  %vm906_vm0 = vweird.f32 %v1463_v34 }
 0x1fe   :  { %1466 = vrcp.f32 %v897_v35  ;;  %vm907_vm2 = vmor %vm905_vm1, %vm906_vm0  ;;  %v926_v56 = vand.u32 2147483648, %v897_v35  ;;  %v924_v59 = vand.u32 2147483647, %v897_v35  ;;  %vm920_vm6 = vweird.f32 %v897_v35 }
 0x1ff   :  { %v902_v37 = vsub.f32 1.0, %v901_v36 }
 0x200   :  { %v881_v39 = vpop.f32.mrf.mxu2  ;;  %v927_v63 = vor.u32 1.1754944e-38, %v926_v56  ;;  %vm925_vm8 = vcmp.eq.f32.partialorder %v924_v59, 8.507059e+37 }
 0x201   :  { %v903_v40 = vmul.f32 %v1463_v34, %v902_v37  ;;  %v887_v42 = vsub.f32 0.0, %v881_v39 }
 0x203   :  { %v1465_v43 = vpop.eup %1464  ;;  %v904_v44 = vadd.f32 %v1463_v34, %v903_v40  ;;  %v894_v45 = vmul.f32 1.442695, %v887_v42 }
 0x204   :  { %v1467_v46 = vpop.eup %1466  ;;  %v898_v49 = vadd.f32 1.0, %v1465_v43 }
 0x205   :  { %v908_v50 = vsel %vm907_vm2, %v1463_v34, %v904_v44  ;;  %v916_v51 = vmul.f32 %v1467_v46, %v897_v35  ;;  %1468 = vpow2.f32 %v894_v45  ;;  %vm921_vm5 = vweird.f32 %v1467_v46 }
 0x206   :  { %v913_v52 = vsel %vm910_vm4, %v912_v47, %v908_v50  ;;  %1470 = vrcp.f32 %v898_v49  ;;  %vm922_vm7 = vmor %vm920_vm6, %vm921_vm5  ;;  %v941_v5 = vand.u32 2147483648, %v898_v49  ;;  %v939_v7 = vand.u32 2147483647, %v898_v49 }
 0x207   :  { %961 = vst.msk [vmem:[%s2073_s6] sm:$0xff] %vm960_vm3, %v913_v52  ;;  %v917_v55 = vsub.f32 1.0, %v916_v51  ;;  %vm935_vm10 = vweird.f32 %v898_v49 }
 0x208   :  { %v942_v10 = vor.u32 1.1754944e-38, %v941_v5  ;;  %vm940_vm12 = vcmp.eq.f32.partialorder %v939_v7, 8.507059e+37 }
 0x209   :  { %v918_v58 = vmul.f32 %v1467_v46, %v917_v55 }
 0x20b   :  { %v1469_v60 = vpop.eup %1468  ;;  %v919_v61 = vadd.f32 %v1467_v46, %v918_v58 }
 0x20c   :  { %v1471_v62 = vpop.eup %1470  ;;  %v899_v0 = vadd.f32 1.0, %v1469_v60 }
 0x20d   :  { %v923_v1 = vsel %vm922_vm7, %v1467_v46, %v919_v61  ;;  %v931_v2 = vmul.f32 %v1471_v62, %v898_v49  ;;  %vm936_vm9 = vweird.f32 %v1471_v62 }
 0x20e   :  { %v928_v3 = vsel %vm925_vm8, %v927_v63, %v923_v1  ;;  %1472 = vrcp.f32 %v899_v0  ;;  %vm937_vm11 = vmor %vm935_vm10, %vm936_vm9  ;;  %v956_v15 = vand.u32 2147483648, %v899_v0  ;;  %v954_v17 = vand.u32 2147483647, %v899_v0 }
 0x20f   :  { %962 = vst.msk [vmem:[%s2073_s6 + $0x8] sm:$0xff] %vm960_vm3, %v928_v3  ;;  %v932_v4 = vsub.f32 1.0, %v931_v2  ;;  %vm950_vm14 = vweird.f32 %v899_v0 }
 0x210   :  { %v957_v19 = vor.u32 1.1754944e-38, %v956_v15  ;;  %vm955_vm0 = vcmp.eq.f32.partialorder %v954_v17, 8.507059e+37 }
 0x211   :  { %v933_v6 = vmul.f32 %v1471_v62, %v932_v4 }
 0x213   :  { %v934_v8 = vadd.f32 %v1471_v62, %v933_v6 }
 0x214   :  { %v1473_v9 = vpop.eup %1472 }
 0x215   :  { %v938_v11 = vsel %vm937_vm11, %v1471_v62, %v934_v8  ;;  %v946_v12 = vmul.f32 %v1473_v9, %v899_v0  ;;  %vm951_vm13 = vweird.f32 %v1473_v9 }
 0x216   :  { %v943_v13 = vsel %vm940_vm12, %v942_v10, %v938_v11  ;;  %vm952_vm15 = vmor %vm950_vm14, %vm951_vm13 }
 0x217   :  { %963 = vst.msk [vmem:[%s2073_s6 + $0x10] sm:$0xff] %vm960_vm3, %v943_v13  ;;  %v947_v14 = vsub.f32 1.0, %v946_v12 }
 0x219   :  { %v948_v16 = vmul.f32 %v1473_v9, %v947_v14 }
 0x21b   :  { %v949_v18 = vadd.f32 %v1473_v9, %v948_v16 }
 0x21d   :  { %v953_v20 = vsel %vm952_vm15, %v1473_v9, %v949_v18 }
 0x21e   :  { %v958_v21 = vsel %vm955_vm0, %v957_v19, %v953_v20 }
 0x21f   :  { %964 = vst.msk [vmem:[%s2073_s6 + $0x18] sm:$0xff] %vm960_vm3, %v958_v21 }

</bundles_post_ra>
